<compile_context>
chip_gen: v5e
topology: v5e:2x2
jax: 0.10.0
libtpu: 0.0.40
codegen_flags: <defaults>
</compile_context>

<pallas_src>
import math

import jax
import jax.numpy as jnp
from jax import lax
from jax.experimental import pallas as pl
from jax.experimental.pallas import tpu as pltpu


def lstm_seq_kernel(x_ref, w_ih_ref, w_hh_ref, b_ref, out_ref):
    """Whole LSTM sequence in one kernel invocation.

    x_ref:    (T*B, D)  time-major, flattened over (T, B)
    w_ih_ref: (D, 4H)   W_ih^T
    w_hh_ref: (H, 4H)   W_hh^T
    b_ref:    (1, 4H)   b_ih + b_hh
    out_ref:  (B, H)    last hidden state
    """
    B, H = out_ref.shape
    TB, _ = x_ref.shape
    T = TB // B  # static at trace time

    # Hoisted input projection: one matmul for all time steps.
    # (T*B, D) @ (D, 4H) + (1, 4H) -> (T*B, 4H)
    zx = (jnp.dot(x_ref[...], w_ih_ref[...],
                  preferred_element_type=jnp.float32)
          + b_ref[...])

    w_hh = w_hh_ref[...]

    h = jnp.zeros((B, H), jnp.float32)
    c = jnp.zeros((B, H), jnp.float32)

    # Serial recurrence; only h @ W_hh^T remains on the critical path.
    # T is small & static -> fully unrolled, all slices static.
    for t in range(T):
        z = zx[t * B:(t + 1) * B, :] + jnp.dot(
            h, w_hh, preferred_element_type=jnp.float32)

        i_g = jax.nn.sigmoid(z[:, 0 * H:1 * H])
        f_g = jax.nn.sigmoid(z[:, 1 * H:2 * H])
        g_g = jnp.tanh(z[:, 2 * H:3 * H])
        o_g = jax.nn.sigmoid(z[:, 3 * H:4 * H])

        c = f_g * c + i_g * g_g
        h = o_g * jnp.tanh(c)

    # Single output store, after the loop.
    out_ref[...] = h


def lstm_last_hidden(x_seq, w_ih_t, w_hh_t, b):
    """x_seq: (T, B, D) f32. Returns (B, H) f32 = last hidden state."""
    T, B, D = x_seq.shape
    H = w_hh_t.shape[0]
    x_flat = x_seq.reshape(T * B, D)  # time-major rows: t*B + b

    return pl.pallas_call(
        lstm_seq_kernel,
        out_shape=jax.ShapeDtypeStruct((B, H), jnp.float32),
        grid_spec=pltpu.PrefetchScalarGridSpec(
            num_scalar_prefetch=0,
            grid=(1,),
            in_specs=[
                pl.BlockSpec((T * B, D), lambda i: (0, 0)),      # x (all steps)
                pl.BlockSpec((D, 4 * H), lambda i: (0, 0)),      # W_ih^T
                pl.BlockSpec((H, 4 * H), lambda i: (0, 0)),      # W_hh^T
                pl.BlockSpec((1, 4 * H), lambda i: (0, 0)),      # bias
            ],
            out_specs=pl.BlockSpec((B, H), lambda i: (0, 0)),
        ),
        compiler_params=pltpu.CompilerParams(
            dimension_semantics=("arbitrary",)),
    )(x_flat, w_ih_t, w_hh_t, b)


def init_params(key, state_dim, hidden_size):
    """PyTorch-style LSTM init: U(-1/sqrt(H), 1/sqrt(H)) for all params."""
    k = 1.0 / math.sqrt(hidden_size)
    k1, k2, k3, k4 = jax.random.split(key, 4)
    w_ih = jax.random.uniform(k1, (4 * hidden_size, state_dim), jnp.float32, -k, k)
    w_hh = jax.random.uniform(k2, (4 * hidden_size, hidden_size), jnp.float32, -k, k)
    b_ih = jax.random.uniform(k3, (4 * hidden_size,), jnp.float32, -k, k)
    b_hh = jax.random.uniform(k4, (4 * hidden_size,), jnp.float32, -k, k)
    return {
        "w_ih_t": w_ih.T,                # (D, 4H)
        "w_hh_t": w_hh.T,                # (H, 4H)
        "b": (b_ih + b_hh)[None, :],     # (1, 4H)
    }


def node_history_encoder_forward(input_seqs, params):
    """input_seqs: (batch, seq, A, B, state_dim). Returns (batch, hidden)."""
    x = input_seqs[:, :, 1, 1]            # (batch, seq, state_dim)
    x = jnp.transpose(x, (1, 0, 2))       # (seq, batch, state_dim)  time-major
    return lstm_last_hidden(x, params["w_ih_t"], params["w_hh_t"], params["b"])


def _reference_forward(input_seqs, params):
    """Pure-JAX reference (lax.scan LSTM), for correctness checking."""
    x = jnp.transpose(input_seqs[:, :, 1, 1], (1, 0, 2))  # (T, B, D)
    B = x.shape[1]
    H = params["w_hh_t"].shape[0]

    def step(carry, x_t):
        h, c = carry
        z = x_t @ params["w_ih_t"] + h @ params["w_hh_t"] + params["b"]
        i_g = jax.nn.sigmoid(z[:, 0 * H:1 * H])
        f_g = jax.nn.sigmoid(z[:, 1 * H:2 * H])
        g_g = jnp.tanh(z[:, 2 * H:3 * H])
        o_g = jax.nn.sigmoid(z[:, 3 * H:4 * H])
        c_new = f_g * c + i_g * g_g
        h_new = o_g * jnp.tanh(c_new)
        return (h_new, c_new), None

    init = (jnp.zeros((B, H), jnp.float32), jnp.zeros((B, H), jnp.float32))
    (h_last, _), _ = lax.scan(step, init, x)
    return h_last


if __name__ == "__main__":
    batch, seq_len, A, Bs, state_dim = 2, 8, 4, 4, 6
    hidden_size = 32

    key = jax.random.PRNGKey(0)
    k_in, k_par = jax.random.split(key)
    input_seqs = jax.random.normal(
        k_in, (batch, seq_len, A, Bs, state_dim), jnp.float32)
    params = init_params(k_par, state_dim, hidden_size)

    out = node_history_encoder_forward(input_seqs, params)
    out = jax.block_until_ready(out)

    ref = _reference_forward(input_seqs, params)
    assert out.shape == (batch, hidden_size)
    assert jnp.allclose(out, ref, atol=1e-5, rtol=1e-5)

    print("KERNEL_OK")
</pallas_src>

<mosaic_0001>
module attributes {stable_mosaic.version = 11 : i64} {
  func.func @lstm_seq_kernel(%arg0: i32, %arg1: memref<16x6xf32, #tpu.memory_space<vmem>>, %arg2: memref<6x128xf32, #tpu.memory_space<vmem>>, %arg3: memref<32x128xf32, #tpu.memory_space<vmem>>, %arg4: memref<1x128xf32, #tpu.memory_space<vmem>>, %arg5: memref<2x32xf32, #tpu.memory_space<vmem>>) attributes {dimension_semantics = [#tpu.dimension_semantics<arbitrary>], iteration_bounds = array<i64: 1>, scalar_prefetch = 0 : i64, scratch_operands = 0 : i64, tpu.core_type = #tpu.core_type<tc>, window_params = [{pipeline_mode = #tpu.pipeline_mode<synchronous>, transform_indices = @transform_0, window_bounds = array<i64: 16, 6>}, {pipeline_mode = #tpu.pipeline_mode<synchronous>, transform_indices = @transform_1, window_bounds = array<i64: 6, 128>}, {pipeline_mode = #tpu.pipeline_mode<synchronous>, transform_indices = @transform_2, window_bounds = array<i64: 32, 128>}, {pipeline_mode = #tpu.pipeline_mode<synchronous>, transform_indices = @transform_3, window_bounds = array<i64: 1, 128>}, {pipeline_mode = #tpu.pipeline_mode<synchronous>, transform_indices = @transform_4, window_bounds = array<i64: 2, 32>}]} {
    %c0 = arith.constant 0 : index
    %c0_0 = arith.constant 0 : index
    %0 = vector.load %arg1[%c0, %c0_0] : memref<16x6xf32, #tpu.memory_space<vmem>>, vector<16x6xf32>
    %c0_1 = arith.constant 0 : index
    %c0_2 = arith.constant 0 : index
    %1 = vector.load %arg2[%c0_1, %c0_2] : memref<6x128xf32, #tpu.memory_space<vmem>>, vector<6x128xf32>
    %cst = arith.constant dense<0.000000e+00> : vector<16x128xf32>
    %2 = tpu.matmul %0, %1, %cst {dimension_numbers = #tpu.dot_dimension_numbers<[1], [0], [0], [1], [0, 0, 1, 1], [], []>} : vector<16x6xf32>, vector<6x128xf32>, vector<16x128xf32> -> vector<16x128xf32>
    %c0_3 = arith.constant 0 : index
    %c0_4 = arith.constant 0 : index
    %3 = vector.load %arg4[%c0_3, %c0_4] : memref<1x128xf32, #tpu.memory_space<vmem>>, vector<1x128xf32>
    %4 = vector.broadcast %3 : vector<1x128xf32> to vector<16x128xf32>
    %5 = arith.addf %2, %4 : vector<16x128xf32>
    %c0_5 = arith.constant 0 : index
    %c0_6 = arith.constant 0 : index
    %6 = vector.load %arg3[%c0_5, %c0_6] : memref<32x128xf32, #tpu.memory_space<vmem>>, vector<32x128xf32>
    %cst_7 = arith.constant 0.000000e+00 : f32
    %7 = vector.broadcast %cst_7 : f32 to vector<2x32xf32>
    %cst_8 = arith.constant 0.000000e+00 : f32
    %8 = vector.broadcast %cst_8 : f32 to vector<2x32xf32>
    %9 = vector.extract_strided_slice %5 {offsets = [0, 0], sizes = [2, 128], strides = [1, 1]} : vector<16x128xf32> to vector<2x128xf32>
    %cst_9 = arith.constant dense<0.000000e+00> : vector<2x128xf32>
    %10 = tpu.matmul %7, %6, %cst_9 {dimension_numbers = #tpu.dot_dimension_numbers<[1], [0], [0], [1], [0, 0, 1, 1], [], []>} : vector<2x32xf32>, vector<32x128xf32>, vector<2x128xf32> -> vector<2x128xf32>
    %11 = arith.addf %9, %10 : vector<2x128xf32>
    %12 = vector.extract_strided_slice %11 {offsets = [0, 0], sizes = [2, 32], strides = [1, 1]} : vector<2x128xf32> to vector<2x32xf32>
    %13 = arith.negf %12 : vector<2x32xf32>
    %14 = math.exp %13 : vector<2x32xf32>
    %cst_10 = arith.constant 1.000000e+00 : f32
    %15 = vector.broadcast %cst_10 : f32 to vector<2x32xf32>
    %16 = arith.addf %15, %14 : vector<2x32xf32>
    %17 = arith.divf %15, %16 : vector<2x32xf32>
    %18 = vector.extract_strided_slice %11 {offsets = [0, 32], sizes = [2, 32], strides = [1, 1]} : vector<2x128xf32> to vector<2x32xf32>
    %19 = arith.negf %18 : vector<2x32xf32>
    %20 = math.exp %19 : vector<2x32xf32>
    %cst_11 = arith.constant 1.000000e+00 : f32
    %21 = vector.broadcast %cst_11 : f32 to vector<2x32xf32>
    %22 = arith.addf %21, %20 : vector<2x32xf32>
    %23 = arith.divf %21, %22 : vector<2x32xf32>
    %24 = vector.extract_strided_slice %11 {offsets = [0, 64], sizes = [2, 32], strides = [1, 1]} : vector<2x128xf32> to vector<2x32xf32>
    %25 = math.tanh %24 : vector<2x32xf32>
    %26 = vector.extract_strided_slice %11 {offsets = [0, 96], sizes = [2, 32], strides = [1, 1]} : vector<2x128xf32> to vector<2x32xf32>
    %27 = arith.negf %26 : vector<2x32xf32>
    %28 = math.exp %27 : vector<2x32xf32>
    %cst_12 = arith.constant 1.000000e+00 : f32
    %29 = vector.broadcast %cst_12 : f32 to vector<2x32xf32>
    %30 = arith.addf %29, %28 : vector<2x32xf32>
    %31 = arith.divf %29, %30 : vector<2x32xf32>
    %32 = arith.mulf %23, %8 : vector<2x32xf32>
    %33 = arith.mulf %17, %25 : vector<2x32xf32>
    %34 = arith.addf %32, %33 : vector<2x32xf32>
    %35 = math.tanh %34 : vector<2x32xf32>
    %36 = arith.mulf %31, %35 : vector<2x32xf32>
    %37 = vector.extract_strided_slice %5 {offsets = [2, 0], sizes = [2, 128], strides = [1, 1]} : vector<16x128xf32> to vector<2x128xf32>
    %cst_13 = arith.constant dense<0.000000e+00> : vector<2x128xf32>
    %38 = tpu.matmul %36, %6, %cst_13 {dimension_numbers = #tpu.dot_dimension_numbers<[1], [0], [0], [1], [0, 0, 1, 1], [], []>} : vector<2x32xf32>, vector<32x128xf32>, vector<2x128xf32> -> vector<2x128xf32>
    %39 = arith.addf %37, %38 : vector<2x128xf32>
    %40 = vector.extract_strided_slice %39 {offsets = [0, 0], sizes = [2, 32], strides = [1, 1]} : vector<2x128xf32> to vector<2x32xf32>
    %41 = arith.negf %40 : vector<2x32xf32>
    %42 = math.exp %41 : vector<2x32xf32>
    %cst_14 = arith.constant 1.000000e+00 : f32
    %43 = vector.broadcast %cst_14 : f32 to vector<2x32xf32>
    %44 = arith.addf %43, %42 : vector<2x32xf32>
    %45 = arith.divf %43, %44 : vector<2x32xf32>
    %46 = vector.extract_strided_slice %39 {offsets = [0, 32], sizes = [2, 32], strides = [1, 1]} : vector<2x128xf32> to vector<2x32xf32>
    %47 = arith.negf %46 : vector<2x32xf32>
    %48 = math.exp %47 : vector<2x32xf32>
    %cst_15 = arith.constant 1.000000e+00 : f32
    %49 = vector.broadcast %cst_15 : f32 to vector<2x32xf32>
    %50 = arith.addf %49, %48 : vector<2x32xf32>
    %51 = arith.divf %49, %50 : vector<2x32xf32>
    %52 = vector.extract_strided_slice %39 {offsets = [0, 64], sizes = [2, 32], strides = [1, 1]} : vector<2x128xf32> to vector<2x32xf32>
    %53 = math.tanh %52 : vector<2x32xf32>
    %54 = vector.extract_strided_slice %39 {offsets = [0, 96], sizes = [2, 32], strides = [1, 1]} : vector<2x128xf32> to vector<2x32xf32>
    %55 = arith.negf %54 : vector<2x32xf32>
    %56 = math.exp %55 : vector<2x32xf32>
    %cst_16 = arith.constant 1.000000e+00 : f32
    %57 = vector.broadcast %cst_16 : f32 to vector<2x32xf32>
    %58 = arith.addf %57, %56 : vector<2x32xf32>
    %59 = arith.divf %57, %58 : vector<2x32xf32>
    %60 = arith.mulf %51, %34 : vector<2x32xf32>
    %61 = arith.mulf %45, %53 : vector<2x32xf32>
    %62 = arith.addf %60, %61 : vector<2x32xf32>
    %63 = math.tanh %62 : vector<2x32xf32>
    %64 = arith.mulf %59, %63 : vector<2x32xf32>
    %65 = vector.extract_strided_slice %5 {offsets = [4, 0], sizes = [2, 128], strides = [1, 1]} : vector<16x128xf32> to vector<2x128xf32>
    %cst_17 = arith.constant dense<0.000000e+00> : vector<2x128xf32>
    %66 = tpu.matmul %64, %6, %cst_17 {dimension_numbers = #tpu.dot_dimension_numbers<[1], [0], [0], [1], [0, 0, 1, 1], [], []>} : vector<2x32xf32>, vector<32x128xf32>, vector<2x128xf32> -> vector<2x128xf32>
    %67 = arith.addf %65, %66 : vector<2x128xf32>
    %68 = vector.extract_strided_slice %67 {offsets = [0, 0], sizes = [2, 32], strides = [1, 1]} : vector<2x128xf32> to vector<2x32xf32>
    %69 = arith.negf %68 : vector<2x32xf32>
    %70 = math.exp %69 : vector<2x32xf32>
    %cst_18 = arith.constant 1.000000e+00 : f32
    %71 = vector.broadcast %cst_18 : f32 to vector<2x32xf32>
    %72 = arith.addf %71, %70 : vector<2x32xf32>
    %73 = arith.divf %71, %72 : vector<2x32xf32>
    %74 = vector.extract_strided_slice %67 {offsets = [0, 32], sizes = [2, 32], strides = [1, 1]} : vector<2x128xf32> to vector<2x32xf32>
    %75 = arith.negf %74 : vector<2x32xf32>
    %76 = math.exp %75 : vector<2x32xf32>
    %cst_19 = arith.constant 1.000000e+00 : f32
    %77 = vector.broadcast %cst_19 : f32 to vector<2x32xf32>
    %78 = arith.addf %77, %76 : vector<2x32xf32>
    %79 = arith.divf %77, %78 : vector<2x32xf32>
    %80 = vector.extract_strided_slice %67 {offsets = [0, 64], sizes = [2, 32], strides = [1, 1]} : vector<2x128xf32> to vector<2x32xf32>
    %81 = math.tanh %80 : vector<2x32xf32>
    %82 = vector.extract_strided_slice %67 {offsets = [0, 96], sizes = [2, 32], strides = [1, 1]} : vector<2x128xf32> to vector<2x32xf32>
    %83 = arith.negf %82 : vector<2x32xf32>
    %84 = math.exp %83 : vector<2x32xf32>
    %cst_20 = arith.constant 1.000000e+00 : f32
    %85 = vector.broadcast %cst_20 : f32 to vector<2x32xf32>
    %86 = arith.addf %85, %84 : vector<2x32xf32>
    %87 = arith.divf %85, %86 : vector<2x32xf32>
    %88 = arith.mulf %79, %62 : vector<2x32xf32>
    %89 = arith.mulf %73, %81 : vector<2x32xf32>
    %90 = arith.addf %88, %89 : vector<2x32xf32>
    %91 = math.tanh %90 : vector<2x32xf32>
    %92 = arith.mulf %87, %91 : vector<2x32xf32>
    %93 = vector.extract_strided_slice %5 {offsets = [6, 0], sizes = [2, 128], strides = [1, 1]} : vector<16x128xf32> to vector<2x128xf32>
    %cst_21 = arith.constant dense<0.000000e+00> : vector<2x128xf32>
    %94 = tpu.matmul %92, %6, %cst_21 {dimension_numbers = #tpu.dot_dimension_numbers<[1], [0], [0], [1], [0, 0, 1, 1], [], []>} : vector<2x32xf32>, vector<32x128xf32>, vector<2x128xf32> -> vector<2x128xf32>
    %95 = arith.addf %93, %94 : vector<2x128xf32>
    %96 = vector.extract_strided_slice %95 {offsets = [0, 0], sizes = [2, 32], strides = [1, 1]} : vector<2x128xf32> to vector<2x32xf32>
    %97 = arith.negf %96 : vector<2x32xf32>
    %98 = math.exp %97 : vector<2x32xf32>
    %cst_22 = arith.constant 1.000000e+00 : f32
    %99 = vector.broadcast %cst_22 : f32 to vector<2x32xf32>
    %100 = arith.addf %99, %98 : vector<2x32xf32>
    %101 = arith.divf %99, %100 : vector<2x32xf32>
    %102 = vector.extract_strided_slice %95 {offsets = [0, 32], sizes = [2, 32], strides = [1, 1]} : vector<2x128xf32> to vector<2x32xf32>
    %103 = arith.negf %102 : vector<2x32xf32>
    %104 = math.exp %103 : vector<2x32xf32>
    %cst_23 = arith.constant 1.000000e+00 : f32
    %105 = vector.broadcast %cst_23 : f32 to vector<2x32xf32>
    %106 = arith.addf %105, %104 : vector<2x32xf32>
    %107 = arith.divf %105, %106 : vector<2x32xf32>
    %108 = vector.extract_strided_slice %95 {offsets = [0, 64], sizes = [2, 32], strides = [1, 1]} : vector<2x128xf32> to vector<2x32xf32>
    %109 = math.tanh %108 : vector<2x32xf32>
    %110 = vector.extract_strided_slice %95 {offsets = [0, 96], sizes = [2, 32], strides = [1, 1]} : vector<2x128xf32> to vector<2x32xf32>
    %111 = arith.negf %110 : vector<2x32xf32>
    %112 = math.exp %111 : vector<2x32xf32>
    %cst_24 = arith.constant 1.000000e+00 : f32
    %113 = vector.broadcast %cst_24 : f32 to vector<2x32xf32>
    %114 = arith.addf %113, %112 : vector<2x32xf32>
    %115 = arith.divf %113, %114 : vector<2x32xf32>
    %116 = arith.mulf %107, %90 : vector<2x32xf32>
    %117 = arith.mulf %101, %109 : vector<2x32xf32>
    %118 = arith.addf %116, %117 : vector<2x32xf32>
    %119 = math.tanh %118 : vector<2x32xf32>
    %120 = arith.mulf %115, %119 : vector<2x32xf32>
    %121 = vector.extract_strided_slice %5 {offsets = [8, 0], sizes = [2, 128], strides = [1, 1]} : vector<16x128xf32> to vector<2x128xf32>
    %cst_25 = arith.constant dense<0.000000e+00> : vector<2x128xf32>
    %122 = tpu.matmul %120, %6, %cst_25 {dimension_numbers = #tpu.dot_dimension_numbers<[1], [0], [0], [1], [0, 0, 1, 1], [], []>} : vector<2x32xf32>, vector<32x128xf32>, vector<2x128xf32> -> vector<2x128xf32>
    %123 = arith.addf %121, %122 : vector<2x128xf32>
    %124 = vector.extract_strided_slice %123 {offsets = [0, 0], sizes = [2, 32], strides = [1, 1]} : vector<2x128xf32> to vector<2x32xf32>
    %125 = arith.negf %124 : vector<2x32xf32>
    %126 = math.exp %125 : vector<2x32xf32>
    %cst_26 = arith.constant 1.000000e+00 : f32
    %127 = vector.broadcast %cst_26 : f32 to vector<2x32xf32>
    %128 = arith.addf %127, %126 : vector<2x32xf32>
    %129 = arith.divf %127, %128 : vector<2x32xf32>
    %130 = vector.extract_strided_slice %123 {offsets = [0, 32], sizes = [2, 32], strides = [1, 1]} : vector<2x128xf32> to vector<2x32xf32>
    %131 = arith.negf %130 : vector<2x32xf32>
    %132 = math.exp %131 : vector<2x32xf32>
    %cst_27 = arith.constant 1.000000e+00 : f32
    %133 = vector.broadcast %cst_27 : f32 to vector<2x32xf32>
    %134 = arith.addf %133, %132 : vector<2x32xf32>
    %135 = arith.divf %133, %134 : vector<2x32xf32>
    %136 = vector.extract_strided_slice %123 {offsets = [0, 64], sizes = [2, 32], strides = [1, 1]} : vector<2x128xf32> to vector<2x32xf32>
    %137 = math.tanh %136 : vector<2x32xf32>
    %138 = vector.extract_strided_slice %123 {offsets = [0, 96], sizes = [2, 32], strides = [1, 1]} : vector<2x128xf32> to vector<2x32xf32>
    %139 = arith.negf %138 : vector<2x32xf32>
    %140 = math.exp %139 : vector<2x32xf32>
    %cst_28 = arith.constant 1.000000e+00 : f32
    %141 = vector.broadcast %cst_28 : f32 to vector<2x32xf32>
    %142 = arith.addf %141, %140 : vector<2x32xf32>
    %143 = arith.divf %141, %142 : vector<2x32xf32>
    %144 = arith.mulf %135, %118 : vector<2x32xf32>
    %145 = arith.mulf %129, %137 : vector<2x32xf32>
    %146 = arith.addf %144, %145 : vector<2x32xf32>
    %147 = math.tanh %146 : vector<2x32xf32>
    %148 = arith.mulf %143, %147 : vector<2x32xf32>
    %149 = vector.extract_strided_slice %5 {offsets = [10, 0], sizes = [2, 128], strides = [1, 1]} : vector<16x128xf32> to vector<2x128xf32>
    %cst_29 = arith.constant dense<0.000000e+00> : vector<2x128xf32>
    %150 = tpu.matmul %148, %6, %cst_29 {dimension_numbers = #tpu.dot_dimension_numbers<[1], [0], [0], [1], [0, 0, 1, 1], [], []>} : vector<2x32xf32>, vector<32x128xf32>, vector<2x128xf32> -> vector<2x128xf32>
    %151 = arith.addf %149, %150 : vector<2x128xf32>
    %152 = vector.extract_strided_slice %151 {offsets = [0, 0], sizes = [2, 32], strides = [1, 1]} : vector<2x128xf32> to vector<2x32xf32>
    %153 = arith.negf %152 : vector<2x32xf32>
    %154 = math.exp %153 : vector<2x32xf32>
    %cst_30 = arith.constant 1.000000e+00 : f32
    %155 = vector.broadcast %cst_30 : f32 to vector<2x32xf32>
    %156 = arith.addf %155, %154 : vector<2x32xf32>
    %157 = arith.divf %155, %156 : vector<2x32xf32>
    %158 = vector.extract_strided_slice %151 {offsets = [0, 32], sizes = [2, 32], strides = [1, 1]} : vector<2x128xf32> to vector<2x32xf32>
    %159 = arith.negf %158 : vector<2x32xf32>
    %160 = math.exp %159 : vector<2x32xf32>
    %cst_31 = arith.constant 1.000000e+00 : f32
    %161 = vector.broadcast %cst_31 : f32 to vector<2x32xf32>
    %162 = arith.addf %161, %160 : vector<2x32xf32>
    %163 = arith.divf %161, %162 : vector<2x32xf32>
    %164 = vector.extract_strided_slice %151 {offsets = [0, 64], sizes = [2, 32], strides = [1, 1]} : vector<2x128xf32> to vector<2x32xf32>
    %165 = math.tanh %164 : vector<2x32xf32>
    %166 = vector.extract_strided_slice %151 {offsets = [0, 96], sizes = [2, 32], strides = [1, 1]} : vector<2x128xf32> to vector<2x32xf32>
    %167 = arith.negf %166 : vector<2x32xf32>
    %168 = math.exp %167 : vector<2x32xf32>
    %cst_32 = arith.constant 1.000000e+00 : f32
    %169 = vector.broadcast %cst_32 : f32 to vector<2x32xf32>
    %170 = arith.addf %169, %168 : vector<2x32xf32>
    %171 = arith.divf %169, %170 : vector<2x32xf32>
    %172 = arith.mulf %163, %146 : vector<2x32xf32>
    %173 = arith.mulf %157, %165 : vector<2x32xf32>
    %174 = arith.addf %172, %173 : vector<2x32xf32>
    %175 = math.tanh %174 : vector<2x32xf32>
    %176 = arith.mulf %171, %175 : vector<2x32xf32>
    %177 = vector.extract_strided_slice %5 {offsets = [12, 0], sizes = [2, 128], strides = [1, 1]} : vector<16x128xf32> to vector<2x128xf32>
    %cst_33 = arith.constant dense<0.000000e+00> : vector<2x128xf32>
    %178 = tpu.matmul %176, %6, %cst_33 {dimension_numbers = #tpu.dot_dimension_numbers<[1], [0], [0], [1], [0, 0, 1, 1], [], []>} : vector<2x32xf32>, vector<32x128xf32>, vector<2x128xf32> -> vector<2x128xf32>
    %179 = arith.addf %177, %178 : vector<2x128xf32>
    %180 = vector.extract_strided_slice %179 {offsets = [0, 0], sizes = [2, 32], strides = [1, 1]} : vector<2x128xf32> to vector<2x32xf32>
    %181 = arith.negf %180 : vector<2x32xf32>
    %182 = math.exp %181 : vector<2x32xf32>
    %cst_34 = arith.constant 1.000000e+00 : f32
    %183 = vector.broadcast %cst_34 : f32 to vector<2x32xf32>
    %184 = arith.addf %183, %182 : vector<2x32xf32>
    %185 = arith.divf %183, %184 : vector<2x32xf32>
    %186 = vector.extract_strided_slice %179 {offsets = [0, 32], sizes = [2, 32], strides = [1, 1]} : vector<2x128xf32> to vector<2x32xf32>
    %187 = arith.negf %186 : vector<2x32xf32>
    %188 = math.exp %187 : vector<2x32xf32>
    %cst_35 = arith.constant 1.000000e+00 : f32
    %189 = vector.broadcast %cst_35 : f32 to vector<2x32xf32>
    %190 = arith.addf %189, %188 : vector<2x32xf32>
    %191 = arith.divf %189, %190 : vector<2x32xf32>
    %192 = vector.extract_strided_slice %179 {offsets = [0, 64], sizes = [2, 32], strides = [1, 1]} : vector<2x128xf32> to vector<2x32xf32>
    %193 = math.tanh %192 : vector<2x32xf32>
    %194 = vector.extract_strided_slice %179 {offsets = [0, 96], sizes = [2, 32], strides = [1, 1]} : vector<2x128xf32> to vector<2x32xf32>
    %195 = arith.negf %194 : vector<2x32xf32>
    %196 = math.exp %195 : vector<2x32xf32>
    %cst_36 = arith.constant 1.000000e+00 : f32
    %197 = vector.broadcast %cst_36 : f32 to vector<2x32xf32>
    %198 = arith.addf %197, %196 : vector<2x32xf32>
    %199 = arith.divf %197, %198 : vector<2x32xf32>
    %200 = arith.mulf %191, %174 : vector<2x32xf32>
    %201 = arith.mulf %185, %193 : vector<2x32xf32>
    %202 = arith.addf %200, %201 : vector<2x32xf32>
    %203 = math.tanh %202 : vector<2x32xf32>
    %204 = arith.mulf %199, %203 : vector<2x32xf32>
    %205 = vector.extract_strided_slice %5 {offsets = [14, 0], sizes = [2, 128], strides = [1, 1]} : vector<16x128xf32> to vector<2x128xf32>
    %cst_37 = arith.constant dense<0.000000e+00> : vector<2x128xf32>
    %206 = tpu.matmul %204, %6, %cst_37 {dimension_numbers = #tpu.dot_dimension_numbers<[1], [0], [0], [1], [0, 0, 1, 1], [], []>} : vector<2x32xf32>, vector<32x128xf32>, vector<2x128xf32> -> vector<2x128xf32>
    %207 = arith.addf %205, %206 : vector<2x128xf32>
    %208 = vector.extract_strided_slice %207 {offsets = [0, 0], sizes = [2, 32], strides = [1, 1]} : vector<2x128xf32> to vector<2x32xf32>
    %209 = arith.negf %208 : vector<2x32xf32>
    %210 = math.exp %209 : vector<2x32xf32>
    %cst_38 = arith.constant 1.000000e+00 : f32
    %211 = vector.broadcast %cst_38 : f32 to vector<2x32xf32>
    %212 = arith.addf %211, %210 : vector<2x32xf32>
    %213 = arith.divf %211, %212 : vector<2x32xf32>
    %214 = vector.extract_strided_slice %207 {offsets = [0, 32], sizes = [2, 32], strides = [1, 1]} : vector<2x128xf32> to vector<2x32xf32>
    %215 = arith.negf %214 : vector<2x32xf32>
    %216 = math.exp %215 : vector<2x32xf32>
    %cst_39 = arith.constant 1.000000e+00 : f32
    %217 = vector.broadcast %cst_39 : f32 to vector<2x32xf32>
    %218 = arith.addf %217, %216 : vector<2x32xf32>
    %219 = arith.divf %217, %218 : vector<2x32xf32>
    %220 = vector.extract_strided_slice %207 {offsets = [0, 64], sizes = [2, 32], strides = [1, 1]} : vector<2x128xf32> to vector<2x32xf32>
    %221 = math.tanh %220 : vector<2x32xf32>
    %222 = vector.extract_strided_slice %207 {offsets = [0, 96], sizes = [2, 32], strides = [1, 1]} : vector<2x128xf32> to vector<2x32xf32>
    %223 = arith.negf %222 : vector<2x32xf32>
    %224 = math.exp %223 : vector<2x32xf32>
    %cst_40 = arith.constant 1.000000e+00 : f32
    %225 = vector.broadcast %cst_40 : f32 to vector<2x32xf32>
    %226 = arith.addf %225, %224 : vector<2x32xf32>
    %227 = arith.divf %225, %226 : vector<2x32xf32>
    %228 = arith.mulf %219, %202 : vector<2x32xf32>
    %229 = arith.mulf %213, %221 : vector<2x32xf32>
    %230 = arith.addf %228, %229 : vector<2x32xf32>
    %231 = math.tanh %230 : vector<2x32xf32>
    %232 = arith.mulf %227, %231 : vector<2x32xf32>
    %c0_41 = arith.constant 0 : index
    %c0_42 = arith.constant 0 : index
    %233 = vector.load %arg5[%c0_41, %c0_42] : memref<2x32xf32, #tpu.memory_space<vmem>>, vector<2x32xf32>
    tpu.vector_store %arg5[%c0_41, %c0_42], %232 {strides = array<i32>} : memref<2x32xf32, #tpu.memory_space<vmem>>, vector<2x32xf32>,
    return
  }
  func.func @transform_0(%arg0: i32) -> (i32, i32) {
    %c0_i32 = arith.constant 0 : i32
    %c0_i32_0 = arith.constant 0 : i32
    %c0_i32_1 = arith.constant 0 : i32
    return %c0_i32, %c0_i32_0 : i32, i32
  }
  func.func @transform_1(%arg0: i32) -> (i32, i32) {
    %c0_i32 = arith.constant 0 : i32
    %c0_i32_0 = arith.constant 0 : i32
    %c0_i32_1 = arith.constant 0 : i32
    return %c0_i32, %c0_i32_0 : i32, i32
  }
  func.func @transform_2(%arg0: i32) -> (i32, i32) {
    %c0_i32 = arith.constant 0 : i32
    %c0_i32_0 = arith.constant 0 : i32
    %c0_i32_1 = arith.constant 0 : i32
    return %c0_i32, %c0_i32_0 : i32, i32
  }
  func.func @transform_3(%arg0: i32) -> (i32, i32) {
    %c0_i32 = arith.constant 0 : i32
    %c0_i32_0 = arith.constant 0 : i32
    %c0_i32_1 = arith.constant 0 : i32
    return %c0_i32, %c0_i32_0 : i32, i32
  }
  func.func @transform_4(%arg0: i32) -> (i32, i32) {
    %c0_i32 = arith.constant 0 : i32
    %c0_i32_0 = arith.constant 0 : i32
    %c0_i32_1 = arith.constant 0 : i32
    return %c0_i32, %c0_i32_0 : i32, i32
  }
}

</mosaic_0001>

<bundles_post_ra>
// kernel: tpu_custom_call.1
= control target key start
LH: loop header
LB: loop body
LE: loop exit
PB: predicated region body
PF: predicated region fallthrough
CT: control target
= control target key end

     0   :  { %9 = vsyncpa [#allocation3], 0  ;;  %s898_s0 = inlined_call_operand.vmem [shape: f32[16,6], index: 0, kind: input, shape index: {}]   ;;  %s899_s1 = inlined_call_operand.vmem [shape: f32[6,128], index: 1, kind: input, shape index: {}]   ;;  %s900_s2 = inlined_call_operand.hbm [shape: f32[32,128], index: 2, kind: input, shape index: {}]   ;;  %s901_s3 = inlined_call_operand.vmem [shape: f32[1,128], index: 3, kind: input, shape index: {}]   ;;  %s902_s4 = inlined_call_operand.hbm [shape: f32[2,32], index: 4, kind: output, shape index: {}]  }
   0x1   :  { %10 = vsyncpa [#allocation4], 0  ;;  %s19_s17 = sshll.u32 %s900_s2, 4  ;;  %s791_s18 = smov [#allocation2]   ;;  %s20_s17 = int_to_ptr.hbm [resolvable:$true] %s19_s17 }
   0x2   :  { %s21_s19 = sshll.u32 %s791_s18, 4  ;;  %s792_s20 = smov 128   ;;  %s22_s19 = int_to_ptr.vmem [resolvable:$true] %s21_s19 }
   0x3   :  { %s793_s21 = smov 8  }
   0x4   :  { %27 = dma.hbm_to_vmem [thread:$0]  %s20_s17, 512, %s22_s19, [#allocation3], %s792_s20, %s792_s20, %s793_s21  }
   0x5   :  { %787 = dma.done.wait [#allocation3], 512  }
   0x6   :  { %788 = vsyncadd [#allocation3], 4294966784  ;;  %vm48_vm0 = vcmask 1045504   ;;  %vm41_vm1 = vcmask 48128   ;;  %v78_v0 = vld [vmem:[#allocation2 + $0x18] sm:$0xff]  ;;  %v77_v1 = vld [vmem:[#allocation2 + $0x10] sm:$0xff] }
   0x7   :  { %v36_v2 = vld [vmem:[%s899_s1] sm:$0x3f]  ;;  %95 = vmatpush.msra.mxu1 %v78_v0  ;;  %v76_v4 = vld [vmem:[#allocation2 + $0x8] sm:$0xff]  ;;  %158 = vmatpush.msra.mxu2 %v78_v0  ;;  %v794_v6 = vmov 0.0   ;;  %s795_s26 = smov 64   ;;  %vm79_vm6 = vcmask 261120  }
   0x8   :  { %649 = vmatpush.msk.msra.mxu0 %vm48_vm0, %v36_v2  ;;  %v34_v3 = vld [vmem:[%s898_s0] sm:$0xff]  ;;  %228 = vmatpush.msra.mxu3 %v78_v0  ;;  %s639_s6 = sshll.u32 %s902_s4, 4  ;;  %s640_s6 = int_to_ptr.hbm [resolvable:$true] %s639_s6 }
   0x9   :  { %650 = vmatmul.msk.f32.vlgmr.msra.gmra.mxu0 %vm41_vm1, %v34_v3  ;;  %96 = vmatpush.msra.mxu1 %v77_v1  ;;  %v75_v5 = vld [vmem:[#allocation2] sm:$0xff] }
   0xa   :  { %159 = vmatpush.msra.mxu2 %v77_v1  ;;  %504 = vmatpush.msrb.mxu0 %v78_v0  ;;  %v836_v7 = vld [vmem:[%s901_s3] ss:$0 sm:$0xff]  ;;  %s796_s3 = smov 32  }
   0xb   :  { %97 = vmatpush.msra.mxu1 %v76_v4  ;;  %229 = vmatpush.msra.mxu3 %v77_v1 }
   0xc   :  { %160 = vmatpush.msra.mxu2 %v76_v4  ;;  %505 = vmatpush.msrb.mxu0 %v77_v1 }
   0xd   :  { %98 = vmatpush.msra.mxu1 %v75_v5  ;;  %230 = vmatpush.msra.mxu3 %v76_v4 }
   0xe   :  { %99 = vmatmul.f32.vlgmr.msra.gmra.mxu1 %v794_v6  ;;  %161 = vmatpush.msra.mxu2 %v75_v5 }
   0xf   :  { %231 = vmatpush.msra.mxu3 %v75_v5  ;;  %298 = vmatpush.msrb.mxu1 %v78_v0 }
  0x10   :  { %368 = vmatpush.msrb.mxu2 %v78_v0  ;;  %506 = vmatpush.msrb.mxu0 %v76_v4 }
  0x11   :  { %434 = vmatpush.msrb.mxu3 %v78_v0  ;;  %299 = vmatpush.msrb.mxu1 %v77_v1 }
  0x12   :  { %369 = vmatpush.msrb.mxu2 %v77_v1  ;;  %507 = vmatpush.msrb.mxu0 %v75_v5 }
  0x13   :  { %435 = vmatpush.msrb.mxu3 %v77_v1  ;;  %300 = vmatpush.msrb.mxu1 %v76_v4 }
  0x14   :  { %370 = vmatpush.msrb.mxu2 %v76_v4 }
  0x15   :  { %436 = vmatpush.msrb.mxu3 %v76_v4  ;;  %301 = vmatpush.msrb.mxu1 %v75_v5 }
  0x16   :  { %371 = vmatpush.msrb.mxu2 %v75_v5 }
  0x17   :  { %437 = vmatpush.msrb.mxu3 %v75_v5  ;;  %574 = vmatpush.msra.mxu1 %v78_v0 }
  0x19   :  { %575 = vmatpush.msra.mxu1 %v77_v1 }
  0x1b   :  { %576 = vmatpush.msra.mxu1 %v76_v4 }
  0x1d   :  { %577 = vmatpush.msra.mxu1 %v75_v5 }
  0x86   :  { %v69_v8 = vpop.f32.mrf.mxu0 }
  0x87   :  { %v839_v9 = vadd.f32 %v836_v7, %v69_v8 }
  0x8b   :  { %v100_v10 = vpop.f32.mrf.mxu1 }
  0x8c   :  { %v103_v11 = vadd.f32 %v100_v10, %v839_v9 }
  0x8e   :  { %675 = vtanh.f32 %v103_v11  ;;  %v652_v13 = vmul.f32 -1.442695, %v103_v11 }
  0x90   :  { %677 = vpow2.f32 %v652_v13 }
  0x94   :  { %v676_v12 = vpop.eup %675 }
  0x95   :  { %126 = vrot.lane.b32.xlu0 %v676_v12, %s795_s26 }
  0x96   :  { %v678_v14 = vpop.eup %677 }
  0x97   :  { %v107_v15 = vadd.f32 1.0, %v678_v14 }
  0x99   :  { %679 = vrcp.f32 %v107_v15  ;;  %v119_v21 = vand.u32 2147483648, %v107_v15  ;;  %vm113_vm3 = vweird.f32 %v107_v15  ;;  %v117_v22 = vand.u32 2147483647, %v107_v15 }
  0x9b   :  { %v120_v24 = vor.u32 1.1754944e-38, %v119_v21  ;;  %vm118_vm5 = vcmp.eq.f32.partialorder %v117_v22, 8.507059e+37 }
  0x9f   :  { %v680_v16 = vpop.eup %679 }
  0xa0   :  { %v109_v17 = vmul.f32 %v680_v16, %v107_v15  ;;  %vm114_vm2 = vweird.f32 %v680_v16 }
  0xa1   :  { %vm115_vm4 = vmor %vm113_vm3, %vm114_vm2 }
  0xa2   :  { %v110_v18 = vsub.f32 1.0, %v109_v17 }
  0xa4   :  { %v111_v19 = vmul.f32 %v680_v16, %v110_v18 }
  0xa6   :  { %v112_v20 = vadd.f32 %v680_v16, %v111_v19 }
  0xa8   :  { %v116_v23 = vsel %vm115_vm4, %v680_v16, %v112_v20 }
  0xa9   :  { %v121_v26 = vsel %vm118_vm5, %v120_v24, %v116_v23 }
  0xaa   :  { %v124_v28 = vmul.f32 0.0, %v121_v26 }
 0x107   :  { %v127_v25 = vpop.permute.xlu0 %126 }
 0x108   :  { %v129_v27 = vmul.f32 %v127_v25, %v121_v26 }
 0x10a   :  { %131 = vrot.lane.b32.xlu0 %v129_v27, %s796_s3 }
 0x17c   :  { %v132_v29 = vpop.permute.xlu0 %131 }
 0x17d   :  { %v134_v30 = vadd.f32 %v132_v29, %v124_v28 }
 0x17f   :  { %681 = vtanh.f32 %v134_v30  ;;  %v191_v54 = vrot.slane %v134_v30, 6 }
 0x185   :  { %v682_v31 = vpop.eup %681 }
 0x186   :  { %137 = vrot.lane.b32.xlu1 %v682_v31, %s795_s26 }
 0x1f8   :  { %v138_v32 = vpop.permute.xlu1 %137 }
 0x1f9   :  { %v140_v33 = vmul.f32 %v138_v32, %v121_v26 }
 0x1fb   :  { %142 = vrot.lane.b32.xlu1 %v140_v33, %s796_s3 }
 0x26d   :  { %v143_v34 = vpop.permute.xlu1 %142 }
 0x26e   :  { %653 = vmatmul.msk.f32.vlgmr.msra.gmra.mxu2 %vm79_vm6, %v143_v34 }
 0x2f1   :  { %v163_v35 = vpop.f32.mrf.mxu2 }
 0x2f2   :  { %v167_v36 = vrot.slane %v163_v35, 6 }
 0x2f4   :  { %v169_v37 = vadd.f32 %v167_v36, %v839_v9 }
 0x2f6   :  { %683 = vtanh.f32 %v169_v37  ;;  %v654_v39 = vmul.f32 -1.442695, %v169_v37 }
 0x2f8   :  { %685 = vpow2.f32 %v654_v39 }
 0x2fc   :  { %v684_v38 = vpop.eup %683 }
 0x2fd   :  { %195 = vrot.lane.b32.xlu2 %v684_v38, %s795_s26 }
 0x2fe   :  { %v686_v40 = vpop.eup %685 }
 0x2ff   :  { %v173_v41 = vadd.f32 1.0, %v686_v40 }
 0x301   :  { %687 = vrcp.f32 %v173_v41  ;;  %v185_v47 = vand.u32 2147483648, %v173_v41  ;;  %vm179_vm8 = vweird.f32 %v173_v41  ;;  %v183_v48 = vand.u32 2147483647, %v173_v41 }
 0x303   :  { %v186_v50 = vor.u32 1.1754944e-38, %v185_v47  ;;  %vm184_vm10 = vcmp.eq.f32.partialorder %v183_v48, 8.507059e+37 }
 0x307   :  { %v688_v42 = vpop.eup %687 }
 0x308   :  { %v175_v43 = vmul.f32 %v688_v42, %v173_v41  ;;  %vm180_vm7 = vweird.f32 %v688_v42 }
 0x309   :  { %vm181_vm9 = vmor %vm179_vm8, %vm180_vm7 }
 0x30a   :  { %v176_v44 = vsub.f32 1.0, %v175_v43 }
 0x30c   :  { %v177_v45 = vmul.f32 %v688_v42, %v176_v44 }
 0x30e   :  { %v178_v46 = vadd.f32 %v688_v42, %v177_v45 }
 0x310   :  { %v182_v49 = vsel %vm181_vm9, %v688_v42, %v178_v46 }
 0x311   :  { %v187_v52 = vsel %vm184_vm10, %v186_v50, %v182_v49 }
 0x312   :  { %v193_v55 = vmul.f32 %v191_v54, %v187_v52 }
 0x357   :  { %v196_v51 = vpop.permute.xlu2 %195 }
 0x358   :  { %v198_v53 = vmul.f32 %v196_v51, %v187_v52 }
 0x35a   :  { %200 = vrot.lane.b32.xlu2 %v198_v53, %s796_s3 }
 0x3b4   :  { %v201_v56 = vpop.permute.xlu2 %200 }
 0x3b5   :  { %v203_v57 = vadd.f32 %v201_v56, %v193_v55  ;;  %v35_v55 = vld [vmem:[%s898_s0 + $0x8] sm:$0xff]  ;;  %s797_s0 = smov [#allocation5]  }
 0x3b6   :  { %651 = vmatmul.msk.f32.gmra.mxu0 %vm41_vm1, %v35_v55  ;;  %s637_s29 = sshll.u32 %s797_s0, 4  ;;  %s638_s29 = int_to_ptr.vmem [resolvable:$true] %s637_s29 }
 0x3b7   :  { %689 = vtanh.f32 %v203_v57  ;;  %v261_v20 = vrot.slane %v203_v57, 6 }
 0x3bd   :  { %v690_v58 = vpop.eup %689 }
 0x3be   :  { %206 = vrot.lane.b32.xlu0 %v690_v58, %s795_s26 }
 0x430   :  { %v207_v59 = vpop.permute.xlu0 %206 }
 0x431   :  { %v209_v60 = vmul.f32 %v207_v59, %v187_v52 }
 0x433   :  { %v211_v61 = vrot.slane %v209_v60, 2  ;;  %v72_v57 = vpop.f32.mrf.mxu0 }
 0x434   :  { %v870_v58 = vadd.f32 %v836_v7, %v72_v57 }
 0x435   :  { %212 = vrot.lane.b32.xlu1 %v211_v61, %s796_s3 }
 0x4a7   :  { %v213_v62 = vpop.permute.xlu1 %212 }
 0x4a8   :  { %655 = vmatmul.msk.f32.vlgmr.msra.gmra.mxu3 %vm79_vm6, %v213_v62 }
 0x52b   :  { %v233_v63 = vpop.f32.mrf.mxu3 }
 0x52c   :  { %v237_v0 = vrot.slane %v233_v63, 4 }
 0x52e   :  { %v239_v1 = vadd.f32 %v237_v0, %v839_v9 }
 0x530   :  { %691 = vtanh.f32 %v239_v1  ;;  %v656_v3 = vmul.f32 -1.442695, %v239_v1 }
 0x532   :  { %693 = vpow2.f32 %v656_v3 }
 0x536   :  { %v692_v2 = vpop.eup %691 }
 0x537   :  { %265 = vrot.lane.b32.xlu2 %v692_v2, %s795_s26 }
 0x538   :  { %v694_v4 = vpop.eup %693 }
 0x539   :  { %v243_v5 = vadd.f32 1.0, %v694_v4 }
 0x53b   :  { %695 = vrcp.f32 %v243_v5  ;;  %v255_v13 = vand.u32 2147483648, %v243_v5  ;;  %vm249_vm12 = vweird.f32 %v243_v5  ;;  %v253_v14 = vand.u32 2147483647, %v243_v5 }
 0x53d   :  { %v256_v16 = vor.u32 1.1754944e-38, %v255_v13  ;;  %vm254_vm14 = vcmp.eq.f32.partialorder %v253_v14, 8.507059e+37 }
 0x541   :  { %v696_v6 = vpop.eup %695 }
 0x542   :  { %v245_v8 = vmul.f32 %v696_v6, %v243_v5  ;;  %vm250_vm11 = vweird.f32 %v696_v6 }
 0x543   :  { %vm251_vm13 = vmor %vm249_vm12, %vm250_vm11 }
 0x544   :  { %v246_v10 = vsub.f32 1.0, %v245_v8 }
 0x546   :  { %v247_v11 = vmul.f32 %v696_v6, %v246_v10 }
 0x548   :  { %v248_v12 = vadd.f32 %v696_v6, %v247_v11 }
 0x54a   :  { %v252_v15 = vsel %vm251_vm13, %v696_v6, %v248_v12 }
 0x54b   :  { %v257_v18 = vsel %vm254_vm14, %v256_v16, %v252_v15 }
 0x54c   :  { %v263_v21 = vmul.f32 %v261_v20, %v257_v18 }
 0x591   :  { %v266_v17 = vpop.permute.xlu2 %265 }
 0x592   :  { %v268_v19 = vmul.f32 %v266_v17, %v257_v18 }
 0x594   :  { %270 = vrot.lane.b32.xlu0 %v268_v19, %s796_s3 }
 0x606   :  { %v271_v22 = vpop.permute.xlu0 %270 }
 0x607   :  { %v273_v23 = vadd.f32 %v271_v22, %v263_v21 }
 0x609   :  { %697 = vtanh.f32 %v273_v23  ;;  %v331_v47 = vrot.slane %v273_v23, 6 }
 0x60f   :  { %v698_v24 = vpop.eup %697 }
 0x610   :  { %276 = vrot.lane.b32.xlu1 %v698_v24, %s795_s26 }
 0x682   :  { %v277_v25 = vpop.permute.xlu1 %276 }
 0x683   :  { %v279_v26 = vmul.f32 %v277_v25, %v257_v18 }
 0x685   :  { %v281_v27 = vrot.slane %v279_v26, 4 }
 0x687   :  { %282 = vrot.lane.b32.xlu2 %v281_v27, %s796_s3 }
 0x6e1   :  { %v283_v28 = vpop.permute.xlu2 %282 }
 0x6e2   :  { %657 = vmatmul.msk.f32.vlgmr.msrb.gmra.mxu1 %vm79_vm6, %v283_v28 }
 0x75f   :  { %v303_v29 = vpop.f32.mrf.mxu1 }
 0x760   :  { %v307_v30 = vrot.slane %v303_v29, 2 }
 0x762   :  { %v309_v31 = vadd.f32 %v307_v30, %v839_v9 }
 0x764   :  { %699 = vtanh.f32 %v309_v31  ;;  %v658_v33 = vmul.f32 -1.442695, %v309_v31 }
 0x766   :  { %701 = vpow2.f32 %v658_v33 }
 0x76a   :  { %v700_v32 = vpop.eup %699 }
 0x76b   :  { %335 = vrot.lane.b32.xlu0 %v700_v32, %s795_s26 }
 0x76c   :  { %v702_v34 = vpop.eup %701 }
 0x76d   :  { %v313_v35 = vadd.f32 1.0, %v702_v34 }
 0x76f   :  { %703 = vrcp.f32 %v313_v35  ;;  %v325_v41 = vand.u32 2147483648, %v313_v35  ;;  %vm319_vm0 = vweird.f32 %v313_v35  ;;  %v323_v42 = vand.u32 2147483647, %v313_v35 }
 0x771   :  { %v326_v43 = vor.u32 1.1754944e-38, %v325_v41  ;;  %vm324_vm3 = vcmp.eq.f32.partialorder %v323_v42, 8.507059e+37 }
 0x775   :  { %v704_v36 = vpop.eup %703 }
 0x776   :  { %v315_v37 = vmul.f32 %v704_v36, %v313_v35  ;;  %vm320_vm15 = vweird.f32 %v704_v36 }
 0x777   :  { %vm321_vm2 = vmor %vm319_vm0, %vm320_vm15 }
 0x778   :  { %v316_v38 = vsub.f32 1.0, %v315_v37 }
 0x77a   :  { %v317_v39 = vmul.f32 %v704_v36, %v316_v38 }
 0x77c   :  { %v318_v40 = vadd.f32 %v704_v36, %v317_v39 }
 0x77e   :  { %v322_v9 = vsel %vm321_vm2, %v704_v36, %v318_v40 }
 0x77f   :  { %v327_v45 = vsel %vm324_vm3, %v326_v43, %v322_v9 }
 0x780   :  { %v333_v48 = vmul.f32 %v331_v47, %v327_v45 }
 0x7dd   :  { %v336_v44 = vpop.permute.xlu0 %335 }
 0x7de   :  { %v338_v46 = vmul.f32 %v336_v44, %v327_v45 }
 0x7e0   :  { %340 = vrot.lane.b32.xlu1 %v338_v46, %s796_s3 }
 0x852   :  { %v341_v49 = vpop.permute.xlu1 %340 }
 0x853   :  { %v343_v50 = vadd.f32 %v341_v49, %v333_v48 }
 0x855   :  { %705 = vtanh.f32 %v343_v50  ;;  %v398_v14 = vrot.slane %v343_v50, 6 }
 0x85b   :  { %v706_v51 = vpop.eup %705 }
 0x85c   :  { %346 = vrot.lane.b32.xlu2 %v706_v51, %s795_s26 }
 0x8b6   :  { %v347_v52 = vpop.permute.xlu2 %346 }
 0x8b7   :  { %v349_v53 = vmul.f32 %v347_v52, %v327_v45 }
 0x8b9   :  { %v351_v54 = vrot.slane %v349_v53, 6 }
 0x8bb   :  { %352 = vrot.lane.b32.xlu0 %v351_v54, %s796_s3 }
 0x92d   :  { %v353_v56 = vpop.permute.xlu0 %352 }
 0x92e   :  { %659 = vmatmul.msk.f32.vlgmr.msrb.gmra.mxu2 %vm79_vm6, %v353_v56 }
 0x9b1   :  { %v373_v59 = vpop.f32.mrf.mxu2 }
 0x9b2   :  { %v376_v60 = vadd.f32 %v373_v59, %v870_v58 }
 0x9b4   :  { %707 = vtanh.f32 %v376_v60  ;;  %v660_v62 = vmul.f32 -1.442695, %v376_v60 }
 0x9b6   :  { %709 = vpow2.f32 %v660_v62 }
 0x9ba   :  { %v708_v61 = vpop.eup %707 }
 0x9bb   :  { %402 = vrot.lane.b32.xlu1 %v708_v61, %s795_s26 }
 0x9bc   :  { %v710_v63 = vpop.eup %709 }
 0x9bd   :  { %v380_v0 = vadd.f32 1.0, %v710_v63 }
 0x9bf   :  { %711 = vrcp.f32 %v380_v0  ;;  %v392_v7 = vand.u32 2147483648, %v380_v0  ;;  %vm386_vm4 = vweird.f32 %v380_v0  ;;  %v390_v6 = vand.u32 2147483647, %v380_v0 }
 0x9c1   :  { %v393_v10 = vor.u32 1.1754944e-38, %v392_v7  ;;  %vm391_vm7 = vcmp.eq.f32.partialorder %v390_v6, 8.507059e+37 }
 0x9c5   :  { %v712_v1 = vpop.eup %711 }
 0x9c6   :  { %v382_v2 = vmul.f32 %v712_v1, %v380_v0  ;;  %vm387_vm1 = vweird.f32 %v712_v1 }
 0x9c7   :  { %vm388_vm5 = vmor %vm386_vm4, %vm387_vm1  ;;  %vm630_vm1 = vcmask 261126  }
 0x9c8   :  { %v383_v3 = vsub.f32 1.0, %v382_v2 }
 0x9ca   :  { %v384_v4 = vmul.f32 %v712_v1, %v383_v3 }
 0x9cc   :  { %v385_v5 = vadd.f32 %v712_v1, %v384_v4 }
 0x9ce   :  { %v389_v8 = vsel %vm388_vm5, %v712_v1, %v385_v5 }
 0x9cf   :  { %v394_v12 = vsel %vm391_vm7, %v393_v10, %v389_v8 }
 0x9d0   :  { %v400_v15 = vmul.f32 %v398_v14, %v394_v12 }
 0xa2d   :  { %v403_v11 = vpop.permute.xlu1 %402 }
 0xa2e   :  { %v405_v13 = vmul.f32 %v403_v11, %v394_v12 }
 0xa30   :  { %407 = vrot.lane.b32.xlu2 %v405_v13, %s796_s3 }
 0xa8a   :  { %v408_v16 = vpop.permute.xlu2 %407 }
 0xa8b   :  { %v410_v17 = vadd.f32 %v408_v16, %v400_v15 }
 0xa8d   :  { %713 = vtanh.f32 %v410_v17  ;;  %v467_v41 = vrot.slane %v410_v17, 6 }
 0xa93   :  { %v714_v18 = vpop.eup %713 }
 0xa94   :  { %413 = vrot.lane.b32.xlu0 %v714_v18, %s795_s26 }
 0xb06   :  { %v414_v19 = vpop.permute.xlu0 %413 }
 0xb07   :  { %v416_v20 = vmul.f32 %v414_v19, %v394_v12 }
 0xb09   :  { %418 = vrot.lane.b32.xlu1 %v416_v20, %s796_s3 }
 0xb7b   :  { %v419_v21 = vpop.permute.xlu1 %418 }
 0xb7c   :  { %661 = vmatmul.msk.f32.vlgmr.msrb.gmra.mxu3 %vm79_vm6, %v419_v21 }
 0xbff   :  { %v439_v22 = vpop.f32.mrf.mxu3 }
 0xc00   :  { %v443_v23 = vrot.slane %v439_v22, 6 }
 0xc02   :  { %v445_v24 = vadd.f32 %v443_v23, %v870_v58 }
 0xc04   :  { %715 = vtanh.f32 %v445_v24  ;;  %v662_v26 = vmul.f32 -1.442695, %v445_v24 }
 0xc06   :  { %717 = vpow2.f32 %v662_v26 }
 0xc0a   :  { %v716_v25 = vpop.eup %715 }
 0xc0b   :  { %471 = vrot.lane.b32.xlu2 %v716_v25, %s795_s26 }
 0xc0c   :  { %v718_v27 = vpop.eup %717 }
 0xc0d   :  { %v449_v28 = vadd.f32 1.0, %v718_v27 }
 0xc0f   :  { %719 = vrcp.f32 %v449_v28  ;;  %v461_v34 = vand.u32 2147483648, %v449_v28  ;;  %vm455_vm9 = vweird.f32 %v449_v28  ;;  %v459_v35 = vand.u32 2147483647, %v449_v28 }
 0xc11   :  { %v462_v37 = vor.u32 1.1754944e-38, %v461_v34  ;;  %vm460_vm11 = vcmp.eq.f32.partialorder %v459_v35, 8.507059e+37 }
 0xc15   :  { %v720_v29 = vpop.eup %719 }
 0xc16   :  { %v451_v30 = vmul.f32 %v720_v29, %v449_v28  ;;  %vm456_vm8 = vweird.f32 %v720_v29 }
 0xc17   :  { %vm457_vm10 = vmor %vm455_vm9, %vm456_vm8 }
 0xc18   :  { %v452_v31 = vsub.f32 1.0, %v451_v30 }
 0xc1a   :  { %v453_v32 = vmul.f32 %v720_v29, %v452_v31 }
 0xc1c   :  { %v454_v33 = vadd.f32 %v720_v29, %v453_v32 }
 0xc1e   :  { %v458_v36 = vsel %vm457_vm10, %v720_v29, %v454_v33 }
 0xc1f   :  { %v463_v39 = vsel %vm460_vm11, %v462_v37, %v458_v36 }
 0xc20   :  { %v469_v42 = vmul.f32 %v467_v41, %v463_v39 }
 0xc65   :  { %v472_v38 = vpop.permute.xlu2 %471 }
 0xc66   :  { %v474_v40 = vmul.f32 %v472_v38, %v463_v39 }
 0xc68   :  { %476 = vrot.lane.b32.xlu0 %v474_v40, %s796_s3 }
 0xcda   :  { %v477_v9 = vpop.permute.xlu0 %476 }
 0xcdb   :  { %v479_v43 = vadd.f32 %v477_v9, %v469_v42 }
 0xcdd   :  { %721 = vtanh.f32 %v479_v43  ;;  %v537_v5 = vrot.slane %v479_v43, 6 }
 0xce3   :  { %v722_v44 = vpop.eup %721 }
 0xce4   :  { %482 = vrot.lane.b32.xlu1 %v722_v44, %s795_s26 }
 0xd56   :  { %v483_v45 = vpop.permute.xlu1 %482 }
 0xd57   :  { %v485_v46 = vmul.f32 %v483_v45, %v463_v39 }
 0xd59   :  { %v487_v47 = vrot.slane %v485_v46, 2 }
 0xd5b   :  { %488 = vrot.lane.b32.xlu2 %v487_v47, %s796_s3 }
 0xdb5   :  { %v489_v48 = vpop.permute.xlu2 %488 }
 0xdb6   :  { %663 = vmatmul.msk.f32.vlgmr.msrb.gmra.mxu0 %vm79_vm6, %v489_v48 }
 0xe33   :  { %v509_v49 = vpop.f32.mrf.mxu0 }
 0xe34   :  { %v513_v50 = vrot.slane %v509_v49, 4 }
 0xe36   :  { %v515_v51 = vadd.f32 %v513_v50, %v870_v58 }
 0xe38   :  { %723 = vtanh.f32 %v515_v51  ;;  %v664_v53 = vmul.f32 -1.442695, %v515_v51 }
 0xe3a   :  { %725 = vpow2.f32 %v664_v53 }
 0xe3e   :  { %v724_v52 = vpop.eup %723 }
 0xe3f   :  { %541 = vrot.lane.b32.xlu0 %v724_v52, %s795_s26 }
 0xe40   :  { %v726_v54 = vpop.eup %725 }
 0xe41   :  { %v519_v55 = vadd.f32 1.0, %v726_v54 }
 0xe43   :  { %727 = vrcp.f32 %v519_v55  ;;  %v531_v62 = vand.u32 2147483648, %v519_v55  ;;  %vm525_vm13 = vweird.f32 %v519_v55  ;;  %v529_v63 = vand.u32 2147483647, %v519_v55 }
 0xe45   :  { %v532_v1 = vor.u32 1.1754944e-38, %v531_v62  ;;  %vm530_vm15 = vcmp.eq.f32.partialorder %v529_v63, 8.507059e+37 }
 0xe49   :  { %v728_v56 = vpop.eup %727 }
 0xe4a   :  { %v521_v57 = vmul.f32 %v728_v56, %v519_v55  ;;  %vm526_vm12 = vweird.f32 %v728_v56 }
 0xe4b   :  { %vm527_vm14 = vmor %vm525_vm13, %vm526_vm12 }
 0xe4c   :  { %v522_v59 = vsub.f32 1.0, %v521_v57 }
 0xe4e   :  { %v523_v60 = vmul.f32 %v728_v56, %v522_v59 }
 0xe50   :  { %v524_v61 = vadd.f32 %v728_v56, %v523_v60 }
 0xe52   :  { %v528_v0 = vsel %vm527_vm14, %v728_v56, %v524_v61 }
 0xe53   :  { %v533_v3 = vsel %vm530_vm15, %v532_v1, %v528_v0 }
 0xe54   :  { %v539_v7 = vmul.f32 %v537_v5, %v533_v3 }
 0xeb1   :  { %v542_v2 = vpop.permute.xlu0 %541 }
 0xeb2   :  { %v544_v4 = vmul.f32 %v542_v2, %v533_v3 }
 0xeb4   :  { %546 = vrot.lane.b32.xlu1 %v544_v4, %s796_s3 }
 0xf26   :  { %v547_v6 = vpop.permute.xlu1 %546 }
 0xf27   :  { %v549_v8 = vadd.f32 %v547_v6, %v539_v7 }
 0xf29   :  { %729 = vtanh.f32 %v549_v8  ;;  %v607_v33 = vrot.slane %v549_v8, 6 }
 0xf2f   :  { %v730_v10 = vpop.eup %729 }
 0xf30   :  { %552 = vrot.lane.b32.xlu2 %v730_v10, %s795_s26 }
 0xf8a   :  { %v553_v11 = vpop.permute.xlu2 %552 }
 0xf8b   :  { %v555_v12 = vmul.f32 %v553_v11, %v533_v3 }
 0xf8d   :  { %v557_v13 = vrot.slane %v555_v12, 4 }
 0xf8f   :  { %558 = vrot.lane.b32.xlu0 %v557_v13, %s796_s3 }
0x1001   :  { %v559_v14 = vpop.permute.xlu0 %558 }
0x1002   :  { %665 = vmatmul.msk.f32.vlgmr.msra.gmra.mxu1 %vm79_vm6, %v559_v14 }
0x107f   :  { %v579_v15 = vpop.f32.mrf.mxu1 }
0x1080   :  { %v583_v16 = vrot.slane %v579_v15, 2 }
0x1082   :  { %v585_v17 = vadd.f32 %v583_v16, %v870_v58 }
0x1084   :  { %731 = vtanh.f32 %v585_v17  ;;  %v666_v19 = vmul.f32 -1.442695, %v585_v17 }
0x1086   :  { %733 = vpow2.f32 %v666_v19 }
0x108a   :  { %v732_v18 = vpop.eup %731 }
0x108b   :  { %611 = vrot.lane.b32.xlu1 %v732_v18, %s795_s26 }
0x108c   :  { %v734_v20 = vpop.eup %733 }
0x108d   :  { %v589_v21 = vadd.f32 1.0, %v734_v20 }
0x108f   :  { %735 = vrcp.f32 %v589_v21  ;;  %v601_v27 = vand.u32 2147483648, %v589_v21  ;;  %vm595_vm6 = vweird.f32 %v589_v21  ;;  %v599_v28 = vand.u32 2147483647, %v589_v21 }
0x1091   :  { %v602_v29 = vor.u32 1.1754944e-38, %v601_v27  ;;  %vm600_vm3 = vcmp.eq.f32.partialorder %v599_v28, 8.507059e+37 }
0x1095   :  { %v736_v22 = vpop.eup %735 }
0x1096   :  { %v591_v23 = vmul.f32 %v736_v22, %v589_v21  ;;  %vm596_vm0 = vweird.f32 %v736_v22 }
0x1097   :  { %vm597_vm2 = vmor %vm595_vm6, %vm596_vm0 }
0x1098   :  { %v592_v24 = vsub.f32 1.0, %v591_v23 }
0x109a   :  { %v593_v25 = vmul.f32 %v736_v22, %v592_v24 }
0x109c   :  { %v594_v26 = vadd.f32 %v736_v22, %v593_v25 }
0x109e   :  { %v598_v58 = vsel %vm597_vm2, %v736_v22, %v594_v26 }
0x109f   :  { %v603_v31 = vsel %vm600_vm3, %v602_v29, %v598_v58 }
0x10a0   :  { %v609_v34 = vmul.f32 %v607_v33, %v603_v31 }
0x10fd   :  { %v612_v30 = vpop.permute.xlu1 %611 }
0x10fe   :  { %v614_v32 = vmul.f32 %v612_v30, %v603_v31 }
0x1100   :  { %616 = vrot.lane.b32.xlu2 %v614_v32, %s796_s3 }
0x115a   :  { %v617_v35 = vpop.permute.xlu2 %616 }
0x115b   :  { %v619_v36 = vadd.f32 %v617_v35, %v609_v34 }
0x115d   :  { %737 = vtanh.f32 %v619_v36 }
0x1163   :  { %v738_v37 = vpop.eup %737 }
0x1164   :  { %622 = vrot.lane.b32.xlu0 %v738_v37, %s795_s26 }
0x11d6   :  { %v623_v38 = vpop.permute.xlu0 %622 }
0x11d7   :  { %v625_v39 = vmul.f32 %v623_v38, %v603_v31 }
0x11d9   :  { %627 = vrot.lane.b32.xlu1 %v625_v39, %s796_s3 }
0x124b   :  { %v628_v40 = vpop.permute.xlu1 %627 }
0x124c   :  { %631 = vst.msk [vmem:[#allocation5 - $0x6] sm:$0xc0] %vm630_vm1, %v628_v40 }
0x124d   :  { %642 = dma.vmem_to_hbm [thread:$0]  %s638_s29, 32, %s640_s6, [#allocation4]  }
0x124e   :  { %789 = dma.done.wait [#allocation4], 32  }
0x124f   :  { %790 = vsyncadd [#allocation4], 4294967264 }
0x1250   :  { %647 = vsyncpa [#allocation3], 1 }
0x1251   :  { %648 = vsyncpa [#allocation4], 1 }

</bundles_post_ra>
